<compile_context>
chip_gen: v6e
topology: v6e:2x2x1
jax: 0.10.0
libtpu: 0.0.40
codegen_flags: <defaults>
</compile_context>

<pallas_src>
import functools

import jax
import jax.numpy as jnp
from jax.experimental import pallas as pl
from jax.experimental.pallas import tpu as pltpu


def _round_up(n, m):
    return ((n + m - 1) // m) * m


def _pad_axis(x, target, axis):
    pad = target - x.shape[axis]
    if pad <= 0:
        return x
    widths = [(0, 0)] * x.ndim
    widths[axis] = (0, pad)
    return jnp.pad(x, widths)


def _pick_members_per_step(E, max_g=4):
    """Largest divisor G<=max_g of E with E//G>=2; prefer an even number of steps."""
    best, best_even = 1, None
    for g in range(1, min(max_g, E) + 1):
        if E % g or E // g < 2:
            continue
        best = g
        if (E // g) % 2 == 0:
            best_even = g
    return best_even if best_even is not None else best


# ---------------------------------------------------------------------------
# Fused Pallas kernel: whole per-member MLP (all layers) in one body.
# ---------------------------------------------------------------------------
def _fused_mlp_kernel(x_ref, b_ref, *refs, acts, G, shared_x, matmul_dtype):
    # x_ref : (TB, Din) if shared else (G, TB, Din)     -- matmul dtype (bf16)
    # b_ref : (G, L+1, MAXD) f32  (all biases, one DMA per step)
    # refs  : w_0 ... w_L, o_ref ;  w_i: (G, din_i, dout_i) bf16
    # o_ref : (G, TB, OUT_PAD) f32
    o_ref = refs[-1]
    w_refs = refs[:-1]
    x_shared = x_ref[...] if shared_x else None
    for g in range(G):                      # static unroll over members in this step
        x = x_shared if shared_x else x_ref[g]
        for i, act in enumerate(acts):
            w = w_refs[i][g]                # (din_i, dout_i)
            y = jnp.dot(x.astype(matmul_dtype), w,
                        preferred_element_type=jnp.float32)
            y = y + b_ref[g, i:i + 1, 0:w.shape[-1]]   # f32 bias row, bcast over rows
            if act == "swish":
                y = y * jax.nn.sigmoid(y)   # sigmoid goes to the EUP slot
            elif act == "leaky_relu":
                y = jnp.where(y > 0, y, 0.01 * y)      # F.leaky_relu default slope
            elif act == "linear":
                pass
            else:
                raise ValueError(f"unknown activation: {act}")
            x = y
        o_ref[g] = x.astype(o_ref.dtype)


def fused_ensemble_mlp(x, weights, bias_pack, acts, *, E, G, shared_x,
                       out_pad, batch_tile):
    """x: [1 or E, B_pad, Din_pad] (matmul dtype);
       weights[i]: [E, din_i, dout_i] bf16; bias_pack: [E, L+1, MAXD] f32."""
    B_pad, din_pad = x.shape[1], x.shape[2]
    TB = batch_tile
    assert B_pad % TB == 0 and E % G == 0
    n_e, n_b = E // G, B_pad // TB

    if shared_x:
        # shared input: same block reused for every member group (no HBM broadcast)
        x_spec = pl.BlockSpec((None, TB, din_pad), lambda eg, bt: (0, bt, 0))
    else:
        x_spec = pl.BlockSpec((G, TB, din_pad), lambda eg, bt: (eg, bt, 0))

    # weight / bias blocks depend only on the member-group index -> resident
    # across the inner batch-tile axis (one weight DMA per member group).
    in_specs = [x_spec,
                pl.BlockSpec((G,) + bias_pack.shape[1:], lambda eg, bt: (eg, 0, 0))]
    args = [x, bias_pack]
    for w in weights:
        in_specs.append(pl.BlockSpec((G,) + w.shape[1:], lambda eg, bt: (eg, 0, 0)))
        args.append(w)

    kernel = functools.partial(_fused_mlp_kernel, acts=tuple(acts), G=G,
                               shared_x=shared_x, matmul_dtype=weights[0].dtype)

    flops = int(2 * E * B_pad * sum(w.shape[1] * w.shape[2] for w in weights))
    transc = int(E * B_pad * sum(w.shape[2]
                                 for w, a in zip(weights, acts) if a == "swish"))
    bytes_acc = int(x.size * x.dtype.itemsize
                    + bias_pack.size * bias_pack.dtype.itemsize
                    + sum(w.size * w.dtype.itemsize for w in weights)
                    + E * B_pad * out_pad * 4)

    # per-step block footprint (double-buffered by Pallas); cap limit at 48 MiB
    # which is safe on v7x (64 MiB core) as well as v5e/v6e (128 MiB).
    blk_bytes = (TB * din_pad * x.dtype.itemsize * (1 if shared_x else G)
                 + G * bias_pack.shape[1] * bias_pack.shape[2] * 4
                 + G * sum(w.shape[1] * w.shape[2] * w.dtype.itemsize for w in weights)
                 + G * TB * out_pad * 4)
    vmem_limit = int(min(48 * 1024 * 1024, max(32 * 1024 * 1024, 4 * blk_bytes)))

    return pl.pallas_call(
        kernel,
        out_shape=jax.ShapeDtypeStruct((E, B_pad, out_pad), jnp.float32),
        grid=(n_e, n_b),
        in_specs=in_specs,
        out_specs=pl.BlockSpec((G, TB, out_pad), lambda eg, bt: (eg, bt, 0)),
        compiler_params=pltpu.CompilerParams(
            dimension_semantics=("parallel", "arbitrary"),
            vmem_limit_bytes=vmem_limit,
        ),
        cost_estimate=pl.CostEstimate(flops=flops, transcendentals=transc,
                                      bytes_accessed=bytes_acc),
    )(*args)


# ---------------------------------------------------------------------------
# CriticEnsemble (forward pass only; update_Qs is training-side)
# ---------------------------------------------------------------------------
class CriticEnsemblePallas:
    def __init__(self, d_action, d_state, n_units, n_layers, ensemble_size,
                 activation, doubleQLearning=True, seed=0,
                 weight_dtype=jnp.bfloat16, batch_tile=256):
        assert n_layers >= 2, "minimum depth of model is 2"
        self.d_action, self.d_state = d_action, d_state
        self.n_units, self.n_layers = n_units, n_layers
        self.ensemble_size = ensemble_size
        self.activation = activation
        self.n_Q_nn = 2 if doubleQLearning else 1
        self.weight_dtype = jnp.dtype(weight_dtype)
        self.batch_tile = batch_tile
        E = self.n_Q_nn * ensemble_size
        self.E = E

        # logical layer dims:
        #   0:                (d_action+d_state) -> n_units, activation
        #   0 < i < n_layers:  n_units -> n_units, activation
        #   n_layers:          n_units -> 1, linear
        dims = [d_action + d_state] + [n_units] * n_layers + [1]
        self.acts = [activation] * n_layers + ["linear"]

        # Minimal HBM-side padding only: K dims to the matmul-dtype sublane
        # granule, final Dout=1 to 8.  No 128-lane padding of weights.
        k_align = 16 if self.weight_dtype == jnp.bfloat16 else 8
        pdims = [_round_up(d, k_align) for d in dims[:-1]] + [_round_up(dims[-1], 8)]
        self.din_pad = pdims[0]
        self.out_pad = pdims[-1]
        maxd = max(pdims[1:])

        key = jax.random.PRNGKey(seed)
        self.weights = []
        bias_pack = jnp.zeros((E, n_layers + 1, maxd), jnp.float32)
        for lyr_idx in range(n_layers + 1):
            din, dout = dims[lyr_idx], dims[lyr_idx + 1]
            dinp, doutp = pdims[lyr_idx], pdims[lyr_idx + 1]
            key, wk, bk = jax.random.split(key, 3)
            # deterministic synthetic init (xavier-ish scale), small random bias
            # TODO(synk): load real checkpoint weights here if bit-matching
            # PyTorch's Linear init matters; padded slots stay exactly zero.
            w = jax.random.normal(wk, (E, din, dout), jnp.float32) / jnp.sqrt(din)
            b = 0.01 * jax.random.normal(bk, (E, dout), jnp.float32)
            w_pad = jnp.zeros((E, dinp, doutp), jnp.float32).at[:, :din, :dout].set(w)
            bias_pack = bias_pack.at[:, lyr_idx, :dout].set(b)
            self.weights.append(w_pad.astype(self.weight_dtype))
        self.bias_pack = bias_pack

        # members per grid step: amortize per-step overhead at tiny B, keep the
        # double-buffered weight working set bounded (v7x 64 MiB core).
        member_bytes = int(sum(w.shape[1] * w.shape[2] * w.dtype.itemsize
                               for w in self.weights) + (n_layers + 1) * maxd * 4)
        G = _pick_members_per_step(E)
        while G > 1 and 2 * G * member_bytes > 12 * 1024 * 1024:
            G -= 1
            while G > 1 and E % G:
                G -= 1
        self.G = G
        # TODO(synk): for n_units so large that even G=1 weights blow the VMEM
        # budget, split layers over an extra "arbitrary" grid axis (or
        # pipeline_mode=pl.Buffered(1) on the largest weight specs).

    # ---- internal: pad input, pre-cast to matmul dtype, run the fused kernel
    def _run(self, x, shared):
        B = x.shape[1]
        tb = min(self.batch_tile, _round_up(B, 16))
        tb = max(16, _round_up(tb, 16))          # bf16 sublane-pack granule
        b_pad = _round_up(B, tb)
        x = _pad_axis(_pad_axis(x, self.din_pad, 2), b_pad, 1)
        x = x.astype(self.weight_dtype)          # pre-cast: halves input DMA bytes
        out = fused_ensemble_mlp(x, self.weights, self.bias_pack, self.acts,
                                 E=self.E, G=self.G, shared_x=shared,
                                 out_pad=self.out_pad, batch_tile=tb)
        return out[:, :B, :1]                    # slice padding off in JAX glue

    # ---- public API mirroring the PyTorch module ----------------------------
    def forward(self, states, actions):
        """states: [E, B, d_state], actions: [E, B, d_action] -> Qs [E, B, 1]"""
        x = jnp.concatenate((states, actions), axis=2)   # glue: concat outside kernel
        return self._run(x, shared=False)

    def forward_all(self, states, actions):
        """states: [B, d_state], actions: [B, d_action] -> Qs [E, B, 1].
        The shared input is fed ONCE ([1, B, Din]); the kernel's index_map
        reuses the same block for every member group (no E-way HBM broadcast)."""
        x = jnp.concatenate((states, actions), axis=1)[None]
        return self._run(x, shared=True)

    def min_ensemble(self, states, actions):
        Qs = self.forward_all(states, actions)
        return jnp.min(Qs, axis=0)

    def random_ensemble(self, states, actions, key):
        # NOTE: mirrors PyTorch CriticEnsemble, which draws indices in
        # [0, ensemble_size) even though Qs has n_Q_nn*ensemble_size rows.
        B = states.shape[0]
        Qs = self.forward_all(states, actions)
        i = jax.random.randint(key, (B,), 0, self.ensemble_size)
        j = jnp.arange(B)
        return Qs[i, j]

    # TODO(synk): update_Qs (Adam + smooth_l1 + grad clipping) is a training-time
    # op with no forward-pass Pallas equivalent; omitted here.

    # ---- pure-JAX reference (identical padded bf16 math) for correctness ----
    def forward_ref(self, states, actions):
        x = jnp.concatenate((states, actions), axis=2)
        x = _pad_axis(x, self.din_pad, 2).astype(self.weight_dtype)
        for i, (w, act) in enumerate(zip(self.weights, self.acts)):
            b = self.bias_pack[:, i:i + 1, :w.shape[2]]
            y = jnp.einsum("ebi,eio->ebo", x.astype(w.dtype), w,
                           preferred_element_type=jnp.float32) + b
            if act == "swish":
                y = y * jax.nn.sigmoid(y)
            elif act == "leaky_relu":
                y = jnp.where(y > 0, y, 0.01 * y)
            x = y
        return x[:, :, :1]


if __name__ == "__main__":
    d_state, d_action = 5, 3
    n_units, n_layers = 32, 2
    ensemble_size = 3
    batch = 8

    critic = CriticEnsemblePallas(
        d_action=d_action, d_state=d_state, n_units=n_units, n_layers=n_layers,
        ensemble_size=ensemble_size, activation="swish",
        doubleQLearning=True, seed=0)

    E = critic.E  # 6

    key = jax.random.PRNGKey(0)
    ks, ka = jax.random.split(key)
    states = jax.random.normal(ks, (E, batch, d_state), jnp.float32)
    actions = jax.random.normal(ka, (E, batch, d_action), jnp.float32)

    # per-member forward
    qs = jax.block_until_ready(critic.forward(states, actions))
    ref = critic.forward_ref(states, actions)
    assert qs.shape == (E, batch, 1), qs.shape
    assert jnp.allclose(qs, ref, atol=1e-2, rtol=1e-2), "forward mismatch vs reference"

    # shared-input forward_all (no HBM broadcast) against broadcast reference
    s2 = jax.random.normal(jax.random.PRNGKey(1), (batch, d_state), jnp.float32)
    a2 = jax.random.normal(jax.random.PRNGKey(2), (batch, d_action), jnp.float32)
    qs_all = jax.block_until_ready(critic.forward_all(s2, a2))
    ref_all = critic.forward_ref(
        jnp.broadcast_to(s2[None], (E, batch, d_state)),
        jnp.broadcast_to(a2[None], (E, batch, d_action)))
    assert qs_all.shape == (E, batch, 1), qs_all.shape
    assert jnp.allclose(qs_all, ref_all, atol=1e-2, rtol=1e-2), "forward_all mismatch"

    # exercise min_ensemble / random_ensemble glue paths once
    jax.block_until_ready(critic.min_ensemble(s2, a2))
    jax.block_until_ready(critic.random_ensemble(s2, a2, jax.random.PRNGKey(3)))

    print("KERNEL_OK")
</pallas_src>

<mosaic_0001>
module attributes {stable_mosaic.version = 11 : i64} {
  func.func @_fused_mlp_kernel(%arg0: i32, %arg1: i32, %arg2: memref<3x16x16xbf16, #tpu.memory_space<vmem>>, %arg3: memref<3x3x32xf32, #tpu.memory_space<vmem>>, %arg4: memref<3x16x32xbf16, #tpu.memory_space<vmem>>, %arg5: memref<3x32x32xbf16, #tpu.memory_space<vmem>>, %arg6: memref<3x32x8xbf16, #tpu.memory_space<vmem>>, %arg7: memref<3x16x8xf32, #tpu.memory_space<vmem>>) attributes {dimension_semantics = [#tpu.dimension_semantics<parallel>, #tpu.dimension_semantics<arbitrary>], iteration_bounds = array<i64: 2, 1>, scalar_prefetch = 0 : i64, scratch_operands = 0 : i64, tpu.core_type = #tpu.core_type<tc>, window_params = [{transform_indices = @transform_0, window_bounds = array<i64: 3, 16, 16>}, {transform_indices = @transform_1, window_bounds = array<i64: 3, 3, 32>}, {transform_indices = @transform_2, window_bounds = array<i64: 3, 16, 32>}, {transform_indices = @transform_3, window_bounds = array<i64: 3, 32, 32>}, {transform_indices = @transform_4, window_bounds = array<i64: 3, 32, 8>}, {transform_indices = @transform_5, window_bounds = array<i64: 3, 16, 8>}]} {
    %c0 = arith.constant 0 : index
    %c0_0 = arith.constant 0 : index
    %c0_1 = arith.constant 0 : index
    %0 = vector.load %arg2[%c0, %c0_0, %c0_1] : memref<3x16x16xbf16, #tpu.memory_space<vmem>>, vector<1x16x16xbf16>
    %1 = vector.shape_cast %0 : vector<1x16x16xbf16> to vector<16x16xbf16>
    %c0_2 = arith.constant 0 : index
    %c0_3 = arith.constant 0 : index
    %c0_4 = arith.constant 0 : index
    %2 = vector.load %arg4[%c0_2, %c0_3, %c0_4] : memref<3x16x32xbf16, #tpu.memory_space<vmem>>, vector<1x16x32xbf16>
    %3 = vector.shape_cast %2 : vector<1x16x32xbf16> to vector<16x32xbf16>
    %cst = arith.constant dense<0.000000e+00> : vector<16x32xf32>
    %4 = tpu.matmul %1, %3, %cst {dimension_numbers = #tpu.dot_dimension_numbers<[1], [0], [0], [1], [0, 0, 1, 1], [], []>} : vector<16x16xbf16>, vector<16x32xbf16>, vector<16x32xf32> -> vector<16x32xf32>
    %c0_5 = arith.constant 0 : index
    %c0_6 = arith.constant 0 : index
    %c0_7 = arith.constant 0 : index
    %5 = vector.load %arg3[%c0_5, %c0_6, %c0_7] : memref<3x3x32xf32, #tpu.memory_space<vmem>>, vector<1x1x32xf32>
    %6 = vector.shape_cast %5 : vector<1x1x32xf32> to vector<1x32xf32>
    %7 = vector.broadcast %6 : vector<1x32xf32> to vector<16x32xf32>
    %8 = arith.addf %4, %7 : vector<16x32xf32>
    %9 = arith.negf %8 : vector<16x32xf32>
    %10 = math.exp %9 : vector<16x32xf32>
    %cst_8 = arith.constant 1.000000e+00 : f32
    %11 = vector.broadcast %cst_8 : f32 to vector<16x32xf32>
    %12 = arith.addf %11, %10 : vector<16x32xf32>
    %13 = arith.divf %11, %12 : vector<16x32xf32>
    %14 = arith.mulf %8, %13 : vector<16x32xf32>
    %c0_9 = arith.constant 0 : index
    %c0_10 = arith.constant 0 : index
    %c0_11 = arith.constant 0 : index
    %15 = vector.load %arg5[%c0_9, %c0_10, %c0_11] : memref<3x32x32xbf16, #tpu.memory_space<vmem>>, vector<1x32x32xbf16>
    %16 = vector.shape_cast %15 : vector<1x32x32xbf16> to vector<32x32xbf16>
    %17 = arith.truncf %14 : vector<16x32xf32> to vector<16x32xbf16>
    %cst_12 = arith.constant dense<0.000000e+00> : vector<16x32xf32>
    %18 = tpu.matmul %17, %16, %cst_12 {dimension_numbers = #tpu.dot_dimension_numbers<[1], [0], [0], [1], [0, 0, 1, 1], [], []>} : vector<16x32xbf16>, vector<32x32xbf16>, vector<16x32xf32> -> vector<16x32xf32>
    %c0_13 = arith.constant 0 : index
    %c1 = arith.constant 1 : index
    %c0_14 = arith.constant 0 : index
    %19 = vector.load %arg3[%c0_13, %c1, %c0_14] : memref<3x3x32xf32, #tpu.memory_space<vmem>>, vector<1x1x32xf32>
    %20 = vector.shape_cast %19 : vector<1x1x32xf32> to vector<1x32xf32>
    %21 = vector.broadcast %20 : vector<1x32xf32> to vector<16x32xf32>
    %22 = arith.addf %18, %21 : vector<16x32xf32>
    %23 = arith.negf %22 : vector<16x32xf32>
    %24 = math.exp %23 : vector<16x32xf32>
    %cst_15 = arith.constant 1.000000e+00 : f32
    %25 = vector.broadcast %cst_15 : f32 to vector<16x32xf32>
    %26 = arith.addf %25, %24 : vector<16x32xf32>
    %27 = arith.divf %25, %26 : vector<16x32xf32>
    %28 = arith.mulf %22, %27 : vector<16x32xf32>
    %c0_16 = arith.constant 0 : index
    %c0_17 = arith.constant 0 : index
    %c0_18 = arith.constant 0 : index
    %29 = vector.load %arg6[%c0_16, %c0_17, %c0_18] : memref<3x32x8xbf16, #tpu.memory_space<vmem>>, vector<1x32x8xbf16>
    %30 = vector.shape_cast %29 : vector<1x32x8xbf16> to vector<32x8xbf16>
    %31 = arith.truncf %28 : vector<16x32xf32> to vector<16x32xbf16>
    %cst_19 = arith.constant dense<0.000000e+00> : vector<16x8xf32>
    %32 = tpu.matmul %31, %30, %cst_19 {dimension_numbers = #tpu.dot_dimension_numbers<[1], [0], [0], [1], [0, 0, 1, 1], [], []>} : vector<16x32xbf16>, vector<32x8xbf16>, vector<16x8xf32> -> vector<16x8xf32>
    %c0_20 = arith.constant 0 : index
    %c2 = arith.constant 2 : index
    %c0_21 = arith.constant 0 : index
    %33 = vector.load %arg3[%c0_20, %c2, %c0_21] : memref<3x3x32xf32, #tpu.memory_space<vmem>>, vector<1x1x8xf32>
    %34 = vector.shape_cast %33 : vector<1x1x8xf32> to vector<1x8xf32>
    %35 = vector.broadcast %34 : vector<1x8xf32> to vector<16x8xf32>
    %36 = arith.addf %32, %35 : vector<16x8xf32>
    %c0_22 = arith.constant 0 : index
    %c0_23 = arith.constant 0 : index
    %c0_24 = arith.constant 0 : index
    %37 = vector.load %arg7[%c0_22, %c0_23, %c0_24] : memref<3x16x8xf32, #tpu.memory_space<vmem>>, vector<1x16x8xf32>
    %38 = vector.shape_cast %37 : vector<1x16x8xf32> to vector<16x8xf32>
    %39 = vector.shape_cast %36 : vector<16x8xf32> to vector<1x16x8xf32>
    tpu.vector_store %arg7[%c0_22, %c0_23, %c0_24], %39 {strides = array<i32>} : memref<3x16x8xf32, #tpu.memory_space<vmem>>, vector<1x16x8xf32>,
    %c1_25 = arith.constant 1 : index
    %c0_26 = arith.constant 0 : index
    %c0_27 = arith.constant 0 : index
    %40 = vector.load %arg2[%c1_25, %c0_26, %c0_27] : memref<3x16x16xbf16, #tpu.memory_space<vmem>>, vector<1x16x16xbf16>
    %41 = vector.shape_cast %40 : vector<1x16x16xbf16> to vector<16x16xbf16>
    %c1_28 = arith.constant 1 : index
    %c0_29 = arith.constant 0 : index
    %c0_30 = arith.constant 0 : index
    %42 = vector.load %arg4[%c1_28, %c0_29, %c0_30] : memref<3x16x32xbf16, #tpu.memory_space<vmem>>, vector<1x16x32xbf16>
    %43 = vector.shape_cast %42 : vector<1x16x32xbf16> to vector<16x32xbf16>
    %cst_31 = arith.constant dense<0.000000e+00> : vector<16x32xf32>
    %44 = tpu.matmul %41, %43, %cst_31 {dimension_numbers = #tpu.dot_dimension_numbers<[1], [0], [0], [1], [0, 0, 1, 1], [], []>} : vector<16x16xbf16>, vector<16x32xbf16>, vector<16x32xf32> -> vector<16x32xf32>
    %c1_32 = arith.constant 1 : index
    %c0_33 = arith.constant 0 : index
    %c0_34 = arith.constant 0 : index
    %45 = vector.load %arg3[%c1_32, %c0_33, %c0_34] : memref<3x3x32xf32, #tpu.memory_space<vmem>>, vector<1x1x32xf32>
    %46 = vector.shape_cast %45 : vector<1x1x32xf32> to vector<1x32xf32>
    %47 = vector.broadcast %46 : vector<1x32xf32> to vector<16x32xf32>
    %48 = arith.addf %44, %47 : vector<16x32xf32>
    %49 = arith.negf %48 : vector<16x32xf32>
    %50 = math.exp %49 : vector<16x32xf32>
    %cst_35 = arith.constant 1.000000e+00 : f32
    %51 = vector.broadcast %cst_35 : f32 to vector<16x32xf32>
    %52 = arith.addf %51, %50 : vector<16x32xf32>
    %53 = arith.divf %51, %52 : vector<16x32xf32>
    %54 = arith.mulf %48, %53 : vector<16x32xf32>
    %c1_36 = arith.constant 1 : index
    %c0_37 = arith.constant 0 : index
    %c0_38 = arith.constant 0 : index
    %55 = vector.load %arg5[%c1_36, %c0_37, %c0_38] : memref<3x32x32xbf16, #tpu.memory_space<vmem>>, vector<1x32x32xbf16>
    %56 = vector.shape_cast %55 : vector<1x32x32xbf16> to vector<32x32xbf16>
    %57 = arith.truncf %54 : vector<16x32xf32> to vector<16x32xbf16>
    %cst_39 = arith.constant dense<0.000000e+00> : vector<16x32xf32>
    %58 = tpu.matmul %57, %56, %cst_39 {dimension_numbers = #tpu.dot_dimension_numbers<[1], [0], [0], [1], [0, 0, 1, 1], [], []>} : vector<16x32xbf16>, vector<32x32xbf16>, vector<16x32xf32> -> vector<16x32xf32>
    %c1_40 = arith.constant 1 : index
    %c1_41 = arith.constant 1 : index
    %c0_42 = arith.constant 0 : index
    %59 = vector.load %arg3[%c1_40, %c1_41, %c0_42] : memref<3x3x32xf32, #tpu.memory_space<vmem>>, vector<1x1x32xf32>
    %60 = vector.shape_cast %59 : vector<1x1x32xf32> to vector<1x32xf32>
    %61 = vector.broadcast %60 : vector<1x32xf32> to vector<16x32xf32>
    %62 = arith.addf %58, %61 : vector<16x32xf32>
    %63 = arith.negf %62 : vector<16x32xf32>
    %64 = math.exp %63 : vector<16x32xf32>
    %cst_43 = arith.constant 1.000000e+00 : f32
    %65 = vector.broadcast %cst_43 : f32 to vector<16x32xf32>
    %66 = arith.addf %65, %64 : vector<16x32xf32>
    %67 = arith.divf %65, %66 : vector<16x32xf32>
    %68 = arith.mulf %62, %67 : vector<16x32xf32>
    %c1_44 = arith.constant 1 : index
    %c0_45 = arith.constant 0 : index
    %c0_46 = arith.constant 0 : index
    %69 = vector.load %arg6[%c1_44, %c0_45, %c0_46] : memref<3x32x8xbf16, #tpu.memory_space<vmem>>, vector<1x32x8xbf16>
    %70 = vector.shape_cast %69 : vector<1x32x8xbf16> to vector<32x8xbf16>
    %71 = arith.truncf %68 : vector<16x32xf32> to vector<16x32xbf16>
    %cst_47 = arith.constant dense<0.000000e+00> : vector<16x8xf32>
    %72 = tpu.matmul %71, %70, %cst_47 {dimension_numbers = #tpu.dot_dimension_numbers<[1], [0], [0], [1], [0, 0, 1, 1], [], []>} : vector<16x32xbf16>, vector<32x8xbf16>, vector<16x8xf32> -> vector<16x8xf32>
    %c1_48 = arith.constant 1 : index
    %c2_49 = arith.constant 2 : index
    %c0_50 = arith.constant 0 : index
    %73 = vector.load %arg3[%c1_48, %c2_49, %c0_50] : memref<3x3x32xf32, #tpu.memory_space<vmem>>, vector<1x1x8xf32>
    %74 = vector.shape_cast %73 : vector<1x1x8xf32> to vector<1x8xf32>
    %75 = vector.broadcast %74 : vector<1x8xf32> to vector<16x8xf32>
    %76 = arith.addf %72, %75 : vector<16x8xf32>
    %c1_51 = arith.constant 1 : index
    %c0_52 = arith.constant 0 : index
    %c0_53 = arith.constant 0 : index
    %77 = vector.load %arg7[%c1_51, %c0_52, %c0_53] : memref<3x16x8xf32, #tpu.memory_space<vmem>>, vector<1x16x8xf32>
    %78 = vector.shape_cast %77 : vector<1x16x8xf32> to vector<16x8xf32>
    %79 = vector.shape_cast %76 : vector<16x8xf32> to vector<1x16x8xf32>
    tpu.vector_store %arg7[%c1_51, %c0_52, %c0_53], %79 {strides = array<i32>} : memref<3x16x8xf32, #tpu.memory_space<vmem>>, vector<1x16x8xf32>,
    %c2_54 = arith.constant 2 : index
    %c0_55 = arith.constant 0 : index
    %c0_56 = arith.constant 0 : index
    %80 = vector.load %arg2[%c2_54, %c0_55, %c0_56] : memref<3x16x16xbf16, #tpu.memory_space<vmem>>, vector<1x16x16xbf16>
    %81 = vector.shape_cast %80 : vector<1x16x16xbf16> to vector<16x16xbf16>
    %c2_57 = arith.constant 2 : index
    %c0_58 = arith.constant 0 : index
    %c0_59 = arith.constant 0 : index
    %82 = vector.load %arg4[%c2_57, %c0_58, %c0_59] : memref<3x16x32xbf16, #tpu.memory_space<vmem>>, vector<1x16x32xbf16>
    %83 = vector.shape_cast %82 : vector<1x16x32xbf16> to vector<16x32xbf16>
    %cst_60 = arith.constant dense<0.000000e+00> : vector<16x32xf32>
    %84 = tpu.matmul %81, %83, %cst_60 {dimension_numbers = #tpu.dot_dimension_numbers<[1], [0], [0], [1], [0, 0, 1, 1], [], []>} : vector<16x16xbf16>, vector<16x32xbf16>, vector<16x32xf32> -> vector<16x32xf32>
    %c2_61 = arith.constant 2 : index
    %c0_62 = arith.constant 0 : index
    %c0_63 = arith.constant 0 : index
    %85 = vector.load %arg3[%c2_61, %c0_62, %c0_63] : memref<3x3x32xf32, #tpu.memory_space<vmem>>, vector<1x1x32xf32>
    %86 = vector.shape_cast %85 : vector<1x1x32xf32> to vector<1x32xf32>
    %87 = vector.broadcast %86 : vector<1x32xf32> to vector<16x32xf32>
    %88 = arith.addf %84, %87 : vector<16x32xf32>
    %89 = arith.negf %88 : vector<16x32xf32>
    %90 = math.exp %89 : vector<16x32xf32>
    %cst_64 = arith.constant 1.000000e+00 : f32
    %91 = vector.broadcast %cst_64 : f32 to vector<16x32xf32>
    %92 = arith.addf %91, %90 : vector<16x32xf32>
    %93 = arith.divf %91, %92 : vector<16x32xf32>
    %94 = arith.mulf %88, %93 : vector<16x32xf32>
    %c2_65 = arith.constant 2 : index
    %c0_66 = arith.constant 0 : index
    %c0_67 = arith.constant 0 : index
    %95 = vector.load %arg5[%c2_65, %c0_66, %c0_67] : memref<3x32x32xbf16, #tpu.memory_space<vmem>>, vector<1x32x32xbf16>
    %96 = vector.shape_cast %95 : vector<1x32x32xbf16> to vector<32x32xbf16>
    %97 = arith.truncf %94 : vector<16x32xf32> to vector<16x32xbf16>
    %cst_68 = arith.constant dense<0.000000e+00> : vector<16x32xf32>
    %98 = tpu.matmul %97, %96, %cst_68 {dimension_numbers = #tpu.dot_dimension_numbers<[1], [0], [0], [1], [0, 0, 1, 1], [], []>} : vector<16x32xbf16>, vector<32x32xbf16>, vector<16x32xf32> -> vector<16x32xf32>
    %c2_69 = arith.constant 2 : index
    %c1_70 = arith.constant 1 : index
    %c0_71 = arith.constant 0 : index
    %99 = vector.load %arg3[%c2_69, %c1_70, %c0_71] : memref<3x3x32xf32, #tpu.memory_space<vmem>>, vector<1x1x32xf32>
    %100 = vector.shape_cast %99 : vector<1x1x32xf32> to vector<1x32xf32>
    %101 = vector.broadcast %100 : vector<1x32xf32> to vector<16x32xf32>
    %102 = arith.addf %98, %101 : vector<16x32xf32>
    %103 = arith.negf %102 : vector<16x32xf32>
    %104 = math.exp %103 : vector<16x32xf32>
    %cst_72 = arith.constant 1.000000e+00 : f32
    %105 = vector.broadcast %cst_72 : f32 to vector<16x32xf32>
    %106 = arith.addf %105, %104 : vector<16x32xf32>
    %107 = arith.divf %105, %106 : vector<16x32xf32>
    %108 = arith.mulf %102, %107 : vector<16x32xf32>
    %c2_73 = arith.constant 2 : index
    %c0_74 = arith.constant 0 : index
    %c0_75 = arith.constant 0 : index
    %109 = vector.load %arg6[%c2_73, %c0_74, %c0_75] : memref<3x32x8xbf16, #tpu.memory_space<vmem>>, vector<1x32x8xbf16>
    %110 = vector.shape_cast %109 : vector<1x32x8xbf16> to vector<32x8xbf16>
    %111 = arith.truncf %108 : vector<16x32xf32> to vector<16x32xbf16>
    %cst_76 = arith.constant dense<0.000000e+00> : vector<16x8xf32>
    %112 = tpu.matmul %111, %110, %cst_76 {dimension_numbers = #tpu.dot_dimension_numbers<[1], [0], [0], [1], [0, 0, 1, 1], [], []>} : vector<16x32xbf16>, vector<32x8xbf16>, vector<16x8xf32> -> vector<16x8xf32>
    %c2_77 = arith.constant 2 : index
    %c2_78 = arith.constant 2 : index
    %c0_79 = arith.constant 0 : index
    %113 = vector.load %arg3[%c2_77, %c2_78, %c0_79] : memref<3x3x32xf32, #tpu.memory_space<vmem>>, vector<1x1x8xf32>
    %114 = vector.shape_cast %113 : vector<1x1x8xf32> to vector<1x8xf32>
    %115 = vector.broadcast %114 : vector<1x8xf32> to vector<16x8xf32>
    %116 = arith.addf %112, %115 : vector<16x8xf32>
    %c2_80 = arith.constant 2 : index
    %c0_81 = arith.constant 0 : index
    %c0_82 = arith.constant 0 : index
    %117 = vector.load %arg7[%c2_80, %c0_81, %c0_82] : memref<3x16x8xf32, #tpu.memory_space<vmem>>, vector<1x16x8xf32>
    %118 = vector.shape_cast %117 : vector<1x16x8xf32> to vector<16x8xf32>
    %119 = vector.shape_cast %116 : vector<16x8xf32> to vector<1x16x8xf32>
    tpu.vector_store %arg7[%c2_80, %c0_81, %c0_82], %119 {strides = array<i32>} : memref<3x16x8xf32, #tpu.memory_space<vmem>>, vector<1x16x8xf32>,
    return
  }
  func.func @transform_0(%arg0: i32, %arg1: i32) -> (i32, i32, i32) {
    %c0_i32 = arith.constant 0 : i32
    %c0_i32_0 = arith.constant 0 : i32
    return %arg0, %arg1, %c0_i32 : i32, i32, i32
  }
  func.func @transform_1(%arg0: i32, %arg1: i32) -> (i32, i32, i32) {
    %c0_i32 = arith.constant 0 : i32
    %c0_i32_0 = arith.constant 0 : i32
    %c0_i32_1 = arith.constant 0 : i32
    return %arg0, %c0_i32, %c0_i32_0 : i32, i32, i32
  }
  func.func @transform_2(%arg0: i32, %arg1: i32) -> (i32, i32, i32) {
    %c0_i32 = arith.constant 0 : i32
    %c0_i32_0 = arith.constant 0 : i32
    %c0_i32_1 = arith.constant 0 : i32
    return %arg0, %c0_i32, %c0_i32_0 : i32, i32, i32
  }
  func.func @transform_3(%arg0: i32, %arg1: i32) -> (i32, i32, i32) {
    %c0_i32 = arith.constant 0 : i32
    %c0_i32_0 = arith.constant 0 : i32
    %c0_i32_1 = arith.constant 0 : i32
    return %arg0, %c0_i32, %c0_i32_0 : i32, i32, i32
  }
  func.func @transform_4(%arg0: i32, %arg1: i32) -> (i32, i32, i32) {
    %c0_i32 = arith.constant 0 : i32
    %c0_i32_0 = arith.constant 0 : i32
    %c0_i32_1 = arith.constant 0 : i32
    return %arg0, %c0_i32, %c0_i32_0 : i32, i32, i32
  }
  func.func @transform_5(%arg0: i32, %arg1: i32) -> (i32, i32, i32) {
    %c0_i32 = arith.constant 0 : i32
    %c0_i32_0 = arith.constant 0 : i32
    return %arg0, %arg1, %c0_i32 : i32, i32, i32
  }
}

</mosaic_0001>

<bundles_post_ra>
// kernel: tpu_custom_call.1
= control target key start
LH: loop header
LB: loop body
LE: loop exit
PB: predicated region body
PF: predicated region fallthrough
CT: control target
= control target key end

     0   :  { %10 = vsyncpa [#allocation3], 0  ;;  %s1949_s0 = inlined_call_operand.hbm [shape: bf16[6,16,16], index: 0, kind: input, shape index: {}]   ;;  %s1950_s1 = inlined_call_operand.vmem [shape: f32[6,3,32], index: 1, kind: input, shape index: {}]   ;;  %s1951_s2 = inlined_call_operand.hbm [shape: bf16[6,16,32], index: 2, kind: input, shape index: {}]   ;;  %s1952_s3 = inlined_call_operand.vmem [shape: bf16[6,32,32], index: 3, kind: input, shape index: {}]   ;;  %s1953_s4 = inlined_call_operand.vmem [shape: bf16[6,32,8], index: 4, kind: input, shape index: {}]   ;;  %s1954_s5 = inlined_call_operand.vmem [shape: f32[6,16,8], index: 5, kind: output, shape index: {}]  }
   0x1   :  { %12 = vsyncpa [#allocation3 + $0x1], 0 }
   0x2   :  { %13 = vsyncpa [#allocation5], 0 }
   0x3   :  { %15 = vsyncpa [#allocation5 + $0x1], 0  ;;  %s1723_s18 = smov 0   ;;  %s1725_s19 = smov 0  }
   0x4   :  { %s1727_s20 = smov 0   ;;  %s1729_s21 = smov 0  }
   0x5   :  { %s1731_s22 = smov 0   ;;  %s1733_s23 = smov 0  }
   0x6 LB: > { %s1243_s24 = sadd.s32 4294967295, %s1685_s23   ;;  %s33_s25 = sadd.s32 1, %s1681_s22  ;;  %s1685_s23 = sphi %s1733_s23, %s21_s23   ;;  %s1681_s22 = sphi %s1731_s22, %s1962_s22   ;;  %s1677_s21 = sphi %s1729_s21, %s1961_s21   ;;  %s1673_s20 = sphi %s1727_s20, %s1960_s20   ;;  %s1669_s19 = sphi %s1725_s19, %s1959_s19   ;;  %s1665_s18 = sphi %s1723_s18, %s1958_s18  }
   0x7   : > { %p35_p0 = scmp.ge.s32.totalorder %s33_s25, 2  ;;  %s42_s26 = sadd.s32 1, %s1673_s20 }
   0x8   : > { %p49_p1 = scmp.ne.s32.totalorder %s1673_s20, %s1669_s19  ;;  %p50_p2 = scmp.eq.s32.totalorder %s1685_s23, 0 }
   0x9   : > { %s1964_s25 = smov (%p35_p0, %s33_s25), 0  ;;  %p55_p4 = scmp.ne.s32.totalorder %s1669_s19, %s1665_s18 }
   0xa   : > { %p51_p3 = por %p50_p2, %p49_p1  ;;  %s37_s27 = ssub.s32 %s1681_s22, %s1964_s25 }
   0xb   : > { %p56_p5 = scmp.eq.s32.totalorder %s1243_s24, 0  ;;  %p40_p6 = scmp.eq.s32.totalorder %s37_s27, 0 }
   0xc   : > { %p1456_p8 = scmp.lt.s32.totalorder %s1685_s23, 2  ;;  %s1771_s30 = sand.u32 1, %s1673_s20  }
   0xd   : > { %p1762_p7 = por %p56_p5, %p55_p4  ;;  %s1350_s6 = smul.u32 384, %s1681_s22 }
   0xe   : > { %s1768_s29 = scalar_select %p40_p6, %s1673_s20, %s42_s26  }
   0xf   : > { %s1442_s7 = smul.u32 24, %s1771_s30  ;;  %s224_s10 = scalar_lea.hbm %s1949_s0, %s1350_s6 }
  0x10   : > { %p1780_p9 = pnand %p1456_p8, %p51_p3  ;;  %s212_s14 = scalar_lea.sflag [#allocation3], %s1771_s30 }
  0x11   : > { %s215_s12 = scalar_lea.vmem [#allocation2], %s1442_s7  ;;  %s1687_s16 = smov [#allocation2]  }
  0x12   : > { %s225_s13 = sshll.u32 %s215_s12, 4  ;;  %p1577_p10 = pneg %p1780_p9  ;;  %s226_s13 = int_to_ptr.vmem [resolvable:$true] %s225_s13 }
  0x13   : > { %s1588_s15 = scalar_lea.vmem %s226_s13, 384  ;;  %s1593_s17 = sshll.u32 %s1687_s16, 4  ;;  %s1594_s17 = int_to_ptr.vmem [resolvable:$false] %s1593_s17 }
  0x14   : > { %p1589_p11 = scmp.ne.s32.totalorder %s226_s13, %s1588_s15  ;;  %s1595_s18 = scalar_lea.vmem %s1594_s17, 768 }
  0x15   : > { %p1596_p0 = scmp.lt.s32.totalorder %s226_s13, %s1594_s17  ;;  %p1597_p1 = scmp.lt.s32.totalorder %s1595_s18, %s1588_s15 }
  0x16   : > { %p1591_p12 = pnand %p1589_p11, %p1577_p10 }
  0x17   : > { %p1598_p2 = por %p1597_p1, %p1596_p0 }
  0x18   : > { %p1592_p13 = pneg %p1591_p12 }
  0x1a   : > { %p1599_p3 = pnand %p1598_p2, %p1592_p13 }
  0x1c   : > { %1602 = shalt.err (!%p1599_p3)
}
  0x1d   : > { %s1688_s24 = smov 64   ;;  %s1689_s26 = smov 4  }
  0x1e   : > { %1452 = dma.hbm_to_vmem [thread:$0]  (!%p1780_p9), %s224_s10, 384, %s226_s13, %s212_s14, %s1688_s24, %s1688_s24, %s1689_s26  }
  0x1f   : > { %p1251_p4 = scmp.ge.s32.totalorder %s1685_s23, 1  ;;  %p284_p5 = scmp.lt.s32.totalorder %s1685_s23, 3 }
  0x20   : > { %s255_s12 = scalar_lea.hbm %s1951_s2, %s1350_s6  ;;  %s248_s15 = scalar_lea.vmem [#allocation4], %s1442_s7 }
  0x21   : > { %p1794_p6 = pnand %p1251_p4, %p284_p5  ;;  %s256_s16 = sshll.u32 %s248_s15, 4  ;;  %s257_s16 = int_to_ptr.vmem [resolvable:$true] %s256_s16 }
  0x22   : > { %s245_s17 = scalar_lea.sflag [#allocation5], %s1771_s30  ;;  %s1616_s18 = scalar_lea.vmem %s257_s16, 384 }
  0x23   : > { %p1617_p8 = scmp.ne.s32.totalorder %s257_s16, %s1616_s18  ;;  %s1690_s10 = smov [#allocation4]  }
  0x24   : > { %s1621_s13 = sshll.u32 %s1690_s10, 4  ;;  %s1622_s13 = int_to_ptr.vmem [resolvable:$false] %s1621_s13 }
  0x25   : > { %p1619_p11 = pnand %p1617_p8, %p1577_p10  ;;  %s1623_s14 = scalar_lea.vmem %s1622_s13, 768 }
  0x26   : > { %p1624_p13 = scmp.lt.s32.totalorder %s257_s16, %s1622_s13  ;;  %p1625_p0 = scmp.lt.s32.totalorder %s1623_s14, %s1616_s18 }
  0x27   : > { %p1620_p12 = pneg %p1619_p11 }
  0x28   : > { %p1626_p1 = por %p1625_p0, %p1624_p13 }
  0x2a   : > { %p1627_p2 = pnand %p1626_p1, %p1620_p12 }
  0x2c   : > { %1630 = shalt.err (!%p1627_p2)
}
  0x2d   : > { %1455 = dma.hbm_to_vmem [thread:$0]  (!%p1780_p9), %s255_s12, 384, %s257_s16, %s245_s17, %s1688_s24, %s1688_s24, %s1689_s26  }
  0x2e   : > { %288 = sbr.rel (%p1794_p6) target bundleno = 1216 (0x4c0), region = 40  ;;  %s290_s30 = sand.u32 (!%p1794_p6), 1, %s1669_s19  }
  0x2f   : > { %s1444_s6 = smul.u32 (!%p1794_p6), 24, %s290_s30  ;;  %s291_s7 = scalar_lea.sflag (!%p1794_p6), [#allocation3], %s290_s30 }
  0x31   : > { %s1812_s8 = scalar_lea.vmem (!%p1794_p6), [#allocation2], %s1444_s6 }
  0x33   : > { %1656 = dma.done.wait (%p1762_p7), %s291_s7, 384  }
  0x34   : > { %1658 = vsyncadd (%p1762_p7), %s291_s7, 4294966912  ;;  %s300_s9 = scalar_lea.sflag [#allocation5], %s290_s30  ;;  %s1818_s15 = scalar_lea.vmem [#allocation4], %s1444_s6 }
  0x35   : > { %1660 = dma.done.wait (%p1762_p7), %s300_s9, 384  }
  0x36   : > { %1662 = vsyncadd (%p1762_p7), %s300_s9, 4294966912  ;;  %s359_s11 = smul.u32 3, %s1677_s21  ;;  %v1691_v0 = vmov 0.0   ;;  %vm1692_vm0 = vmmov 0   ;;  %v1509_v1 = vld [vmem:[%s1818_s15] sm:$0xff]   ;;  %v1510_v2 = vld [vmem:[%s1812_s8] sm:$0xff]  }
  0x37   : > { %1376 = vmatprep.subr.bf16.mxu0 %v1691_v0  ;;  %1378 = vmatprep.mubr.msk.bf16.mxu0 %vm1692_vm0, %v1691_v0  ;;  %vm413_vm1 = vcmask 130048   ;;  %vm494_vm2 = vcmask 261120   ;;  %v1513_v22 = vld [vmem:[%s1818_s15 + $0x8] sm:$0xff]   ;;  %v1514_v24 = vld [vmem:[%s1812_s8 + $0x8] sm:$0xff]   ;;  %vm619_vm3 = vcmask 64512  }
  0x38   : > { %p360_p9 = scmp.lt.s32.totalorder %s359_s11, 5  ;;  %1382 = vmatprep.subr.bf16.mxu1 %v1691_v0  ;;  %1386 = vmatprep.mubr.msk.bf16.mxu1 %vm1692_vm0, %v1691_v0 }
  0x39   : > { %1377 = vmatpush3.bf16.msra.mxu0 %v1509_v1  ;;  %v1519_v1 = vld [vmem:[%s1818_s15 + $0x10] sm:$0xff]  }
  0x3a   : > { %s1966_s11 = smov (!%p360_p9, %s359_s11), 5  ;;  %1390 = vmatprep.subr.bf16.mxu0 %v1691_v0 }
  0x3b   : > { %s1831_s28 = sshll.u32 %s1966_s11, 4  ;;  %s1252_s17 = sshll.u32 %s1966_s11, 2 }
  0x3c   : > { %s1839_s26 = scalar_lea.vmem %s1952_s3, %s1831_s28  ;;  %s1846_s16 = scalar_lea.vmem %s1953_s4, %s1831_s28  ;;  %1379 = vmatmul.mubr.msk.bf16.vlgmr.msra.gmra.mxu0 %vm413_vm1, %v1510_v2 }
  0x3d   : > { %1394 = vmatprep.mubr.msk.bf16.mxu0 %vm1692_vm0, %v1691_v0  ;;  %v1511_v3 = vld [vmem:[%s1839_s26 + $0x8] sm:$0xff]   ;;  %v1512_v4 = vld [vmem:[%s1839_s26] sm:$0xff]   ;;  %s1858_s13 = scalar_lea.vmem %s1950_s1, %s1252_s17  ;;  %v1517_v57 = vld [vmem:[%s1839_s26 + $0x18] sm:$0xff]   ;;  %s1901_s6 = scalar_lea.vmem %s1954_s5, %s1831_s28 }
  0x3e   : > { %1383 = vmatpush3.bf16.msra.mxu1 %v1511_v3  ;;  %v1259_v5 = vld [vmem:[%s1858_s13] ss:$0 sm:$0xff]  ;;  %v1515_v25 = vld [vmem:[%s1846_s16 + $0x8] sm:$0xff]   ;;  %v1265_v27 = vld [vmem:[%s1858_s13 + $0x1] ss:$0 sm:$0xff] }
  0x3f   : > { %1384 = vmatprep.subr.bf16.mxu1 %v1691_v0  ;;  %1391 = vmatpush3.bf16.msra.mxu0 %v1515_v25  ;;  %v1516_v26 = vld [vmem:[%s1846_s16] sm:$0xff]   ;;  %v1518_v60 = vld [vmem:[%s1839_s26 + $0x10] sm:$0xff]  }
  0x40   : > { %1392 = vmatprep.subr.bf16.mxu0 %v1691_v0  ;;  %v1280_v35 = vld [vmem:[%s1858_s13 + $0x4] ss:$0 sm:$0xff]  ;;  %v1520_v3 = vld [vmem:[%s1812_s8 + $0x10] sm:$0xff]  }
  0x42   : > { %1385 = vmatpush3.bf16.msra.mxu1 %v1512_v4  ;;  %v1521_v4 = vld [vmem:[%s1846_s16 + $0x18] sm:$0xff]  }
  0x43   : > { %1398 = vmatprep.subr.bf16.mxu1 %v1691_v0  ;;  %1393 = vmatpush3.bf16.msra.mxu0 %v1516_v26 }
  0x44   : > { %1404 = vmatprep.subr.bf16.mxu0 %v1691_v0 }
  0xfc   : > { %v451_v6 = vpop.f32.mrf.mxu0 }
  0xfd   : > { %v452_v7 = vadd.f32 %v1259_v5, %v451_v6  ;;  %v1271_v6 = vld [vmem:[%s1858_s13 + $0x2] ss:$0 sm:$0xff] }
  0xfe   : > { %v1380_v8 = vpop.f32.mrf.mxu0 }
  0xff   : > { %v1263_v9 = vmul.f32 -1.442695, %v452_v7 }
 0x100   : > { %v454_v10 = vpop.f32.mrf.mxu0 }
 0x101   : > { %1527 = vpow2.f32 %v1263_v9  ;;  %v455_v11 = vadd.f32 %v1259_v5, %v454_v10  ;;  %v1522_v5 = vld [vmem:[%s1846_s16 + $0x10] sm:$0xff]  }
 0x102   : > { %v1381_v12 = vpop.f32.mrf.mxu0 }
 0x103   : > { %v1264_v13 = vmul.f32 -1.442695, %v455_v11 }
 0x105   : > { %1529 = vpow2.f32 %v1264_v13  ;;  %v1291_v13 = vld [vmem:[%s1858_s13 + $0x5] ss:$0 sm:$0xff] }
 0x10e   : > { %v1528_v14 = vpop.eup %1527 }
 0x10f   : > { %v464_v15 = vadd.f32 1.0, %v1528_v14 }
 0x111   : > { %1531 = vrcp.f32 %v464_v15 }
 0x112   : > { %v1530_v16 = vpop.eup %1529 }
 0x113   : > { %v465_v17 = vadd.f32 1.0, %v1530_v16 }
 0x115   : > { %1533 = vrcp.f32 %v465_v17 }
 0x11e   : > { %v1532_v18 = vpop.eup %1531 }
 0x11f   : > { %v470_v20 = vmul.f32 %v1532_v18, %v452_v7 }
 0x122   : > { %v1534_v19 = vpop.eup %1533 }
 0x123   : > { %v471_v21 = vmul.f32 %v1534_v19, %v455_v11 }
 0x125   : > { %v476_v23 = vpack.c.bf16 %v471_v21, %v470_v20  ;;  %v1313_v21 = vld [vmem:[%s1858_s13 + $0x8] ss:$0 sm:$0xff] }
 0x127   : > { %1387 = vmatmul.mubr.msk.bf16.vlgmr.msra.gmra.mxu1 %vm494_vm2, %v476_v23 }
 0x128   : > { %1399 = vmatpush3.bf16.msra.mxu1 %v1513_v22  ;;  %1400 = vmatprep.mubr.msk.bf16.mxu1 %vm1692_vm0, %v1691_v0 }
 0x129   : > { %1412 = vmatprep.subr.bf16.mxu1 %v1691_v0 }
 0x12f   : > { %1401 = vmatmul.mubr.msk.bf16.vlgmr.msra.gmra.mxu1 %vm413_vm1, %v1514_v24 }
 0x130   : > { %1416 = vmatprep.mubr.msk.bf16.mxu1 %vm1692_vm0, %v1691_v0  ;;  %1413 = vmatpush3.bf16.msra.mxu1 %v1521_v4 }
 0x131   : > { %1414 = vmatprep.subr.bf16.mxu1 %v1691_v0 }
 0x134   : > { %1415 = vmatpush3.bf16.msra.mxu1 %v1522_v5 }
 0x135   : > { %1426 = vmatprep.subr.bf16.mxu1 %v1691_v0 }
 0x1e7   : > { %v532_v28 = vpop.f32.mrf.mxu1 }
 0x1e8   : > { %v533_v29 = vadd.f32 %v1265_v27, %v532_v28 }
 0x1e9   : > { %v1388_v30 = vpop.f32.mrf.mxu1 }
 0x1ea   : > { %v1269_v31 = vmul.f32 -1.442695, %v533_v29 }
 0x1eb   : > { %v535_v32 = vpop.f32.mrf.mxu1 }
 0x1ec   : > { %1535 = vpow2.f32 %v1269_v31  ;;  %v536_v33 = vadd.f32 %v1265_v27, %v535_v32 }
 0x1ed   : > { %v1389_v34 = vpop.f32.mrf.mxu1 }
 0x1ee   : > { %v1270_v36 = vmul.f32 -1.442695, %v536_v33 }
 0x1ef   : > { %v682_v37 = vpop.f32.mrf.mxu1 }
 0x1f0   : > { %1537 = vpow2.f32 %v1270_v36  ;;  %v683_v38 = vadd.f32 %v1280_v35, %v682_v37 }
 0x1f1   : > { %v1402_v39 = vpop.f32.mrf.mxu1 }
 0x1f2   : > { %v1284_v40 = vmul.f32 -1.442695, %v683_v38 }
 0x1f3   : > { %v685_v41 = vpop.f32.mrf.mxu1 }
 0x1f4   : > { %1539 = vpow2.f32 %v1284_v40  ;;  %v686_v42 = vadd.f32 %v1280_v35, %v685_v41 }
 0x1f5   : > { %v1403_v43 = vpop.f32.mrf.mxu1 }
 0x1f6   : > { %v1285_v44 = vmul.f32 -1.442695, %v686_v42  ;;  %v1523_v43 = vld [vmem:[%s1839_s26 + $0x28] sm:$0xff]  }
 0x1f8   : > { %1541 = vpow2.f32 %v1285_v44 }
 0x1f9   : > { %v1536_v45 = vpop.eup %1535 }
 0x1fa   : > { %v545_v46 = vadd.f32 1.0, %v1536_v45 }
 0x1fc   : > { %1543 = vrcp.f32 %v545_v46  ;;  %v1524_v46 = vld [vmem:[%s1839_s26 + $0x20] sm:$0xff]  }
 0x1fd   : > { %v1538_v47 = vpop.eup %1537 }
 0x1fe   : > { %v546_v48 = vadd.f32 1.0, %v1538_v47 }
 0x200   : > { %1545 = vrcp.f32 %v546_v48 }
 0x201   : > { %v1540_v49 = vpop.eup %1539 }
 0x202   : > { %v695_v50 = vadd.f32 1.0, %v1540_v49 }
 0x204   : > { %1547 = vrcp.f32 %v695_v50 }
 0x205   : > { %v1542_v51 = vpop.eup %1541 }
 0x206   : > { %v696_v52 = vadd.f32 1.0, %v1542_v51  ;;  %v1525_v51 = vld [vmem:[%s1846_s16 + $0x28] sm:$0xff]  }
 0x208   : > { %1549 = vrcp.f32 %v696_v52  ;;  %v1526_v52 = vld [vmem:[%s1846_s16 + $0x20] sm:$0xff]  }
 0x209   : > { %v1544_v53 = vpop.eup %1543 }
 0x20a   : > { %v551_v55 = vmul.f32 %v1544_v53, %v533_v29  ;;  %v1302_v53 = vld [vmem:[%s1858_s13 + $0x6] ss:$0 sm:$0xff] }
 0x20d   : > { %v1546_v54 = vpop.eup %1545 }
 0x20e   : > { %v552_v56 = vmul.f32 %v1546_v54, %v536_v33 }
 0x210   : > { %v557_v58 = vpack.c.bf16 %v552_v56, %v551_v55 }
 0x211   : > { %v1548_v59 = vpop.eup %1547 }
 0x212   : > { %1395 = vmatmul.mubr.msk.bf16.vlgmr.msra.gmra.mxu0 %vm494_vm2, %v557_v58  ;;  %v701_v62 = vmul.f32 %v1548_v59, %v683_v38 }
 0x213   : > { %1405 = vmatpush3.bf16.msra.mxu0 %v1517_v57  ;;  %1408 = vmatprep.mubr.msk.bf16.mxu0 %vm1692_vm0, %v1691_v0 }
 0x214   : > { %1406 = vmatprep.subr.bf16.mxu0 %v1691_v0 }
 0x215   : > { %v1550_v61 = vpop.eup %1549 }
 0x216   : > { %v702_v63 = vmul.f32 %v1550_v61, %v686_v42 }
 0x217   : > { %1407 = vmatpush3.bf16.msra.mxu0 %v1518_v60  ;;  %v1324_v60 = vld [vmem:[%s1858_s13 + $0x9] ss:$0 sm:$0xff] }
 0x218   : > { %v708_v2 = vpack.c.bf16 %v702_v63, %v701_v62  ;;  %1420 = vmatprep.subr.bf16.mxu0 %v1691_v0 }
 0x21a   : > { %1409 = vmatmul.mubr.msk.bf16.vlgmr.msra.gmra.mxu0 %vm494_vm2, %v708_v2 }
 0x21b   : > { %1421 = vmatpush3.bf16.msra.mxu0 %v1519_v1  ;;  %1422 = vmatprep.mubr.msk.bf16.mxu0 %vm1692_vm0, %v1691_v0 }
 0x21c   : > { %1434 = vmatprep.subr.bf16.mxu0 %v1691_v0 }
 0x222   : > { %1423 = vmatmul.mubr.msk.bf16.vlgmr.msra.gmra.mxu0 %vm413_vm1, %v1520_v3 }
 0x223   : > { %1438 = vmatprep.mubr.msk.bf16.mxu0 %vm1692_vm0, %v1691_v0  ;;  %1435 = vmatpush3.bf16.msra.mxu0 %v1525_v51 }
 0x224   : > { %1436 = vmatprep.subr.bf16.mxu0 %v1691_v0 }
 0x227   : > { %1437 = vmatpush3.bf16.msra.mxu0 %v1526_v52 }
 0x2d2   : > { %v612_v7 = vpop.f32.mrf.mxu0 }
 0x2d3   : > { %v613_v8 = vadd.f32 %v1271_v6, %v612_v7 }
 0x2d4   : > { %v1396_v9 = vpop.f32.mrf.mxu0 }
 0x2d5   : > { %620 = vst.msk [vmem:[%s1901_s6] sm:$0xff] %vm619_vm3, %v613_v8 }
 0x2d6   : > { %v615_v10 = vpop.f32.mrf.mxu0 }
 0x2d7   : > { %v616_v11 = vadd.f32 %v1271_v6, %v615_v10 }
 0x2d8   : > { %v1397_v12 = vpop.f32.mrf.mxu0 }
 0x2d9   : > { %621 = vst.msk [vmem:[%s1901_s6 + $0x8] sm:$0xff] %vm619_vm3, %v616_v11 }
 0x2da   : > { %v763_v14 = vpop.f32.mrf.mxu0 }
 0x2db   : > { %v764_v15 = vadd.f32 %v1291_v13, %v763_v14  ;;  %v1335_v14 = vld [vmem:[%s1858_s13 + $0xa] ss:$0 sm:$0xff] }
 0x2dc   : > { %v1410_v16 = vpop.f32.mrf.mxu0 }
 0x2dd   : > { %v1295_v17 = vmul.f32 -1.442695, %v764_v15 }
 0x2de   : > { %v766_v18 = vpop.f32.mrf.mxu0 }
 0x2df   : > { %1551 = vpow2.f32 %v1295_v17  ;;  %v767_v19 = vadd.f32 %v1291_v13, %v766_v18 }
 0x2e0   : > { %v1411_v20 = vpop.f32.mrf.mxu0 }
 0x2e1   : > { %v1296_v22 = vmul.f32 -1.442695, %v767_v19 }
 0x2e2   : > { %v914_v23 = vpop.f32.mrf.mxu0 }
 0x2e3   : > { %1553 = vpow2.f32 %v1296_v22  ;;  %v915_v24 = vadd.f32 %v1313_v21, %v914_v23 }
 0x2e4   : > { %v1424_v25 = vpop.f32.mrf.mxu0 }
 0x2e5   : > { %v1317_v26 = vmul.f32 -1.442695, %v915_v24 }
 0x2e6   : > { %v917_v27 = vpop.f32.mrf.mxu0 }
 0x2e7   : > { %1555 = vpow2.f32 %v1317_v26  ;;  %v918_v28 = vadd.f32 %v1313_v21, %v917_v27 }
 0x2e8   : > { %v1425_v29 = vpop.f32.mrf.mxu0 }
 0x2e9   : > { %v1318_v30 = vmul.f32 -1.442695, %v918_v28 }
 0x2eb   : > { %1557 = vpow2.f32 %v1318_v30 }
 0x2ec   : > { %v1552_v31 = vpop.eup %1551 }
 0x2ed   : > { %v776_v32 = vadd.f32 1.0, %v1552_v31 }
 0x2ef   : > { %1559 = vrcp.f32 %v776_v32 }
 0x2f0   : > { %v1554_v33 = vpop.eup %1553 }
 0x2f1   : > { %v777_v34 = vadd.f32 1.0, %v1554_v33 }
 0x2f3   : > { %1561 = vrcp.f32 %v777_v34 }
 0x2f4   : > { %v1556_v35 = vpop.eup %1555 }
 0x2f5   : > { %v927_v36 = vadd.f32 1.0, %v1556_v35 }
 0x2f7   : > { %1563 = vrcp.f32 %v927_v36 }
 0x2f8   : > { %v1558_v37 = vpop.eup %1557 }
 0x2f9   : > { %v928_v38 = vadd.f32 1.0, %v1558_v37 }
 0x2fb   : > { %1565 = vrcp.f32 %v928_v38 }
 0x2fc   : > { %v1560_v39 = vpop.eup %1559 }
 0x2fd   : > { %v782_v41 = vmul.f32 %v1560_v39, %v764_v15 }
 0x300   : > { %v1562_v40 = vpop.eup %1561 }
 0x301   : > { %v783_v42 = vmul.f32 %v1562_v40, %v767_v19 }
 0x303   : > { %v789_v44 = vpack.c.bf16 %v783_v42, %v782_v41 }
 0x304   : > { %v1564_v45 = vpop.eup %1563 }
 0x305   : > { %1417 = vmatmul.mubr.msk.bf16.vlgmr.msra.gmra.mxu1 %vm494_vm2, %v789_v44  ;;  %v933_v48 = vmul.f32 %v1564_v45, %v915_v24 }
 0x306   : > { %1427 = vmatpush3.bf16.msra.mxu1 %v1523_v43  ;;  %1430 = vmatprep.mubr.msk.bf16.mxu1 %vm1692_vm0, %v1691_v0 }
 0x307   : > { %1428 = vmatprep.subr.bf16.mxu1 %v1691_v0 }
 0x308   : > { %v1566_v47 = vpop.eup %1565 }
 0x309   : > { %v934_v49 = vmul.f32 %v1566_v47, %v918_v28 }
 0x30a   : > { %1429 = vmatpush3.bf16.msra.mxu1 %v1524_v46 }
 0x30b   : > { %v940_v50 = vpack.c.bf16 %v934_v49, %v933_v48 }
 0x30d   : > { %1431 = vmatmul.mubr.msk.bf16.vlgmr.msra.gmra.mxu1 %vm494_vm2, %v940_v50 }
 0x3c5   : > { %v844_v54 = vpop.f32.mrf.mxu1 }
 0x3c6   : > { %v845_v55 = vadd.f32 %v1302_v53, %v844_v54 }
 0x3c7   : > { %v1418_v56 = vpop.f32.mrf.mxu1 }
 0x3c8   : > { %1306 = vst.msk [vmem:[%s1901_s6 + $0x10] sm:$0xff] %vm619_vm3, %v845_v55 }
 0x3c9   : > { %v847_v57 = vpop.f32.mrf.mxu1 }
 0x3ca   : > { %v848_v58 = vadd.f32 %v1302_v53, %v847_v57 }
 0x3cb   : > { %v1419_v59 = vpop.f32.mrf.mxu1 }
 0x3cc   : > { %1307 = vst.msk [vmem:[%s1901_s6 + $0x18] sm:$0xff] %vm619_vm3, %v848_v58 }
 0x3cd   : > { %v995_v61 = vpop.f32.mrf.mxu1 }
 0x3ce   : > { %v996_v62 = vadd.f32 %v1324_v60, %v995_v61 }
 0x3cf   : > { %v1432_v63 = vpop.f32.mrf.mxu1 }
 0x3d0   : > { %v1328_v1 = vmul.f32 -1.442695, %v996_v62 }
 0x3d1   : > { %v998_v2 = vpop.f32.mrf.mxu1 }
 0x3d2   : > { %1567 = vpow2.f32 %v1328_v1  ;;  %v999_v0 = vadd.f32 %v1324_v60, %v998_v2 }
 0x3d3   : > { %v1433_v3 = vpop.f32.mrf.mxu1 }
 0x3d4   : > { %v1329_v4 = vmul.f32 -1.442695, %v999_v0 }
 0x3d6   : > { %1569 = vpow2.f32 %v1329_v4 }
 0x3df   : > { %v1568_v5 = vpop.eup %1567 }
 0x3e0   : > { %v1008_v6 = vadd.f32 1.0, %v1568_v5 }
 0x3e2   : > { %1571 = vrcp.f32 %v1008_v6 }
 0x3e3   : > { %v1570_v7 = vpop.eup %1569 }
 0x3e4   : > { %v1009_v8 = vadd.f32 1.0, %v1570_v7 }
 0x3e6   : > { %1573 = vrcp.f32 %v1009_v8 }
 0x3ef   : > { %v1572_v9 = vpop.eup %1571 }
 0x3f0   : > { %v1014_v11 = vmul.f32 %v1572_v9, %v996_v62 }
 0x3f3   : > { %v1574_v10 = vpop.eup %1573 }
 0x3f4   : > { %v1015_v12 = vmul.f32 %v1574_v10, %v999_v0 }
 0x3f6   : > { %v1021_v13 = vpack.c.bf16 %v1015_v12, %v1014_v11 }
 0x3f8   : > { %1439 = vmatmul.mubr.msk.bf16.vlgmr.msra.gmra.mxu0 %vm494_vm2, %v1021_v13 }
 0x4b8   : > { %v1076_v15 = vpop.f32.mrf.mxu0 }
 0x4b9   : > { %v1077_v16 = vadd.f32 %v1335_v14, %v1076_v15 }
 0x4ba   : > { %v1440_v17 = vpop.f32.mrf.mxu0 }
 0x4bb   : > { %1339 = vst.msk [vmem:[%s1901_s6 + $0x20] sm:$0xff] %vm619_vm3, %v1077_v16 }
 0x4bc   : > { %v1079_v18 = vpop.f32.mrf.mxu0 }
 0x4bd   : > { %v1080_v19 = vadd.f32 %v1335_v14, %v1079_v18 }
 0x4be   : > { %v1441_v20 = vpop.f32.mrf.mxu0 }
 0x4bf   : > { %1340 = vst.msk [vmem:[%s1901_s6 + $0x28] sm:$0xff] %vm619_vm3, %v1080_v19 }
 0x4c0 PF: > { %s21_s23 = sadd.s32 1, %s1685_s23   ;;  %s1958_s18 = smov %s1669_s19 }
 0x4c1   : > { %p18_p7 = scmp.ge.s32.totalorder %s21_s23, 4   ;;  %s1959_s19 = smov %s1673_s20 }
 0x4c2   : > { %s1960_s20 = smov %s1768_s29  ;;  %s1961_s21 = smov %s1681_s22 }
 0x4c3   : > { %s1962_s22 = smov %s1964_s25  ;;  %20 = sbr.rel (!%p18_p7) target bundleno = 6 (0x6), region = 114 }
 0x4c8   :  { %1119 = vsyncpa [#allocation3], 1 }
 0x4c9   :  { %1121 = vsyncpa [#allocation3 + $0x1], 1 }
 0x4ca   :  { %1122 = vsyncpa [#allocation5], 1 }
 0x4cb   :  { %1124 = vsyncpa [#allocation5 + $0x1], 1 }

</bundles_post_ra>
